<compile_context>
chip_gen: v7x
topology: tpu7x:2x2x1
jax: 0.10.0
libtpu: 0.0.40
codegen_flags: <defaults>
</compile_context>

<pallas_src>
import functools
import numpy as np
import jax
import jax.numpy as jnp
from jax.experimental import pallas as pl
from jax.experimental.pallas import tpu as pltpu  # production re-tile hooks (unused at test shape)

LN_EPS = 1e-5      # nn.LayerNorm default eps
FAVOR_EPS = 1e-4   # performer softmax_kernel eps


def _layernorm_rows(x, gamma, beta):
    """LayerNorm over the last (lane) axis: x (R, C), gamma/beta (1, C)."""
    mu = jnp.mean(x, axis=-1, keepdims=True)
    var = jnp.mean((x - mu) * (x - mu), axis=-1, keepdims=True)
    return (x - mu) * jax.lax.rsqrt(var + LN_EPS) * gamma + beta


def _layernorm_cols(x_t, gamma_col, beta_col):
    """Same LayerNorm, computed directly in transposed (C, R) layout.

    Normalizes over axis 0 (sublane reductions); gamma_col/beta_col are (C, 1).
    Recomputing the LN in this layout is O(N*D) VPU work and lets the key-side
    contraction below keep its contracting dim on the LAST dim of the LHS
    (no in-kernel XLU transpose of k_prime or xn).
    """
    mu = jnp.mean(x_t, axis=0, keepdims=True)
    var = jnp.mean((x_t - mu) * (x_t - mu), axis=0, keepdims=True)
    return (x_t - mu) * jax.lax.rsqrt(var + LN_EPS) * gamma_col + beta_col


def _gelu_tanh(x):
    # TODO(synk): PyTorch nn.GELU() default is the exact erf formulation; the tanh
    # approximation is used (max abs deviation ~3e-4, inside the 1e-3 tolerance)
    # since erf has no guaranteed Mosaic lowering.
    c = np.float32(np.sqrt(2.0 / np.pi))
    return 0.5 * x * (1.0 + jnp.tanh(c * (x + 0.044715 * x * x * x)))


def encoder_block_kernel(x_ref, xt_ref, projs_ref, ln1g_ref, ln1b_ref,
                         ln1g_col_ref, ln1b_col_ref, ln2g_ref, ln2b_ref,
                         w1_ref, b1_ref, w2_ref, b2_ref, out_ref,
                         *, num_heads, lane_dense):
    """Single-shot encoder block on the squeezed (N, D) slab.

    projs_ref already carries the FAVOR data_norm = D**-0.25 scale (folded into
    the projection weights at parameter-prep time).  xt_ref is the transposed
    (D, N) copy of x (wrapper-side layout plumbing).
    """
    x = x_ref[...]                                   # (N, D) f32
    D = x.shape[-1]

    # ---------------- MultiheadFastAttentionBlock (FAVOR+ softmax kernel) ----
    xn = _layernorm_rows(x, ln1g_ref[...], ln1b_ref[...])                       # (N, D)
    xn_t = _layernorm_cols(xt_ref[...], ln1g_col_ref[...], ln1b_col_ref[...])   # (D, N)

    data_norm = D ** -0.25
    # dash = (data_norm * xn) @ proj^T  ==  xn @ (data_norm * proj)^T
    # Contracting dims are the LAST dims of both operands (MXU-native A @ B^T).
    dash = jax.lax.dot_general(xn, projs_ref[...],
                               (((1,), (1,)), ((), ())),
                               preferred_element_type=jnp.float32)    # (N, M)
    diag = jnp.sum(xn * xn, axis=-1, keepdims=True) * (0.5 * data_norm * data_norm)

    row_max = jnp.max(dash, axis=-1, keepdims=True)      # (N, 1) query-path shift
    glob_max = jnp.max(row_max, axis=0, keepdims=True)   # (1, 1) key-path shift
    # Single full (N, M) exp; diag folded into the shift once.  The key path
    # reuses it exactly via an (N, 1) rescale -> half the EUP traffic.
    e = jnp.exp(dash - (diag + row_max))                 # (N, M)
    q_prime = e + FAVOR_EPS
    k_prime = e * jnp.exp(row_max - glob_max) + FAVOR_EPS
    # NOTE: the FAVOR ratio = M**-0.5 scale of q'/k' cancels exactly between
    # numerator and denominator (ratio^2 in each, eps included) -> dropped.

    # non-causal linear attention
    k_cumsum = jnp.sum(k_prime, axis=0, keepdims=True)                # (1, M)
    # VPU multiply + XLU lane-reduce instead of a 1-lane-wide MXU matmul.
    denom = jnp.sum(q_prime * k_cumsum, axis=-1, keepdims=True)       # (N, 1)
    # EUP approximate reciprocal + one Newton step (FAVOR_EPS bounds denom > 0).
    r0 = pl.reciprocal(denom, approx=True)
    d_inv = r0 * (2.0 - denom * r0)
    # context^T = xn^T @ k'  -> (D, M): standard matmul, contracting dim is the
    # last dim of the LHS (no vxpose of k_prime inserted by Mosaic).
    context_t = jnp.dot(xn_t, k_prime, preferred_element_type=jnp.float32)      # (D, M)
    # attn = q' @ context : contract the last dims of q' (N, M) and context^T (D, M).
    attn = jax.lax.dot_general(q_prime, context_t,
                               (((1,), (1,)), ((), ())),
                               preferred_element_type=jnp.float32) * d_inv       # (N, D)

    y = attn + x                                     # residual 1 (x broadcast over heads, B=1)

    # ---------------- MLPBlock (dropout = identity in eval mode) -------------
    yn = _layernorm_rows(y, ln2g_ref[...], ln2b_ref[...])
    h = jnp.dot(yn, w1_ref[...], preferred_element_type=jnp.float32) + b1_ref[...]
    h = _gelu_tanh(h)
    mlp = jnp.dot(h, w2_ref[...], preferred_element_type=jnp.float32) + b2_ref[...]

    res = (mlp + y).astype(out_ref.dtype)            # (N, D), identical for every head
    if lane_dense:
        # H*D is a multiple of 128 -> unmasked full-lane vst of the replicated slab.
        out_ref[...] = jnp.tile(res, (1, num_heads))
    else:
        # Fallback: plain (N, D) store; wrapper broadcasts across heads.
        out_ref[...] = res


def transformer_encoder_block(x, params, num_heads):
    """x: (1, N, D) float32 -> (1, H, N, D) float32 (matches the PyTorch layout)."""
    B, N, D = x.shape
    assert B == 1, "PyTorch residual broadcasting in this module requires batch=1"

    # Lane-dense (N, H*D) writeback only when it stays a full-lane (128-multiple)
    # store; otherwise write (N, D) and broadcast in the wrapper.  Both paths are
    # valid only because every head is bit-identical (q = k = v, shared weights).
    lane_dense = (num_heads * D) % 128 == 0
    out_cols = num_heads * D if lane_dense else D

    kernel = functools.partial(encoder_block_kernel, num_heads=num_heads,
                               lane_dense=lane_dense)
    xs = x[0]                                        # (N, D)
    # Transposed input copy + (D, 1) LN params: pure wrapper-side layout plumbing
    # so the kernel never emits an XLU transpose.
    out = pl.pallas_call(
        kernel,
        out_shape=jax.ShapeDtypeStruct((N, out_cols), jnp.float32),
    )(xs, xs.T, params["proj_scaled"],
      params["ln1_g"], params["ln1_b"],
      params["ln1_g"].reshape(D, 1), params["ln1_b"].reshape(D, 1),
      params["ln2_g"], params["ln2_b"],
      params["w1"], params["b1"], params["w2"], params["b2"])

    if lane_dense:
        # (N, H*D) -> (1, H, N, D): layout plumbing outside the kernel.
        return jnp.transpose(out.reshape(N, num_heads, D), (1, 0, 2))[None]
    return jnp.broadcast_to(out, (1, num_heads, N, D))


def reference(x, params, num_heads):
    """Pure-JAX reference mirroring the PyTorch forward (eval mode), incl. ratio."""
    xs = x[0]                                        # (N, D)
    D = xs.shape[-1]
    M = params["proj"].shape[0]
    xn = _layernorm_rows(xs, params["ln1_g"], params["ln1_b"])
    dn = D ** -0.25
    ratio = M ** -0.5
    dash = (dn * xn) @ params["proj"].T
    diag = jnp.sum(xn * xn, axis=-1, keepdims=True) * 0.5 * dn * dn
    q_prime = ratio * (jnp.exp(dash - diag - jnp.max(dash, axis=-1, keepdims=True)) + FAVOR_EPS)
    k_prime = ratio * (jnp.exp(dash - diag - jnp.max(dash)) + FAVOR_EPS)
    k_cumsum = jnp.sum(k_prime, axis=0)
    d_inv = 1.0 / (q_prime @ k_cumsum)
    context = k_prime.T @ xn
    attn = (q_prime @ context) * d_inv[:, None]
    y = attn + xs
    yn = _layernorm_rows(y, params["ln2_g"], params["ln2_b"])
    h = _gelu_tanh(yn @ params["w1"] + params["b1"])
    mlp = h @ params["w2"] + params["b2"]
    per_head = mlp + y                               # (N, D), identical for every head
    return jnp.broadcast_to(per_head, (1, num_heads) + per_head.shape)


def init_params(key, embedding_dim, mlp_size, nb_features):
    D, F, M = embedding_dim, mlp_size, nb_features
    ks = jax.random.split(key, 6)
    lin = lambda k, fan_in, shape: jax.random.uniform(
        k, shape, jnp.float32, -1.0 / np.sqrt(fan_in), 1.0 / np.sqrt(fan_in))
    # Gaussian random-feature projection (synthetic stand-in for the orthogonal
    # random matrix performer uses).
    proj = jax.random.normal(ks[0], (M, D), jnp.float32)
    return {
        "proj": proj,
        # One-time weight transform: fold the FAVOR data_norm into the weights.
        "proj_scaled": proj * np.float32(D ** -0.25),
        "ln1_g": jnp.ones((1, D), jnp.float32),
        "ln1_b": jnp.zeros((1, D), jnp.float32),
        "ln2_g": jnp.ones((1, D), jnp.float32),
        "ln2_b": jnp.zeros((1, D), jnp.float32),
        "w1": lin(ks[1], D, (D, F)),
        "b1": lin(ks[2], D, (1, F)),
        "w2": lin(ks[3], F, (F, D)),
        "b2": lin(ks[4], F, (1, D)),
    }


if __name__ == "__main__":
    EMBED, HEADS, NB_FEATURES, MLP_SIZE, SEQ = 32, 4, 64, 64, 16
    key = jax.random.PRNGKey(0)
    kx, kp = jax.random.split(key)
    x = jax.random.normal(kx, (1, SEQ, EMBED), jnp.float32)
    params = init_params(kp, EMBED, MLP_SIZE, NB_FEATURES)

    out = transformer_encoder_block(x, params, HEADS)
    out = jax.block_until_ready(out)

    ref = reference(x, params, HEADS)
    assert out.shape == (1, HEADS, SEQ, EMBED), out.shape
    np.testing.assert_allclose(np.asarray(out), np.asarray(ref), rtol=1e-3, atol=1e-3)
    print("KERNEL_OK")
</pallas_src>

<mosaic_0001>
module attributes {stable_mosaic.version = 11 : i64} {
  func.func @encoder_block_kernel(%arg0: memref<16x32xf32, #tpu.memory_space<vmem>>, %arg1: memref<32x16xf32, #tpu.memory_space<vmem>>, %arg2: memref<64x32xf32, #tpu.memory_space<vmem>>, %arg3: memref<1x32xf32, #tpu.memory_space<vmem>>, %arg4: memref<1x32xf32, #tpu.memory_space<vmem>>, %arg5: memref<32x1xf32, #tpu.memory_space<vmem>>, %arg6: memref<32x1xf32, #tpu.memory_space<vmem>>, %arg7: memref<1x32xf32, #tpu.memory_space<vmem>>, %arg8: memref<1x32xf32, #tpu.memory_space<vmem>>, %arg9: memref<32x64xf32, #tpu.memory_space<vmem>>, %arg10: memref<1x64xf32, #tpu.memory_space<vmem>>, %arg11: memref<64x32xf32, #tpu.memory_space<vmem>>, %arg12: memref<1x32xf32, #tpu.memory_space<vmem>>, %arg13: memref<16x128xf32, #tpu.memory_space<vmem>>) attributes {dimension_semantics = [], scalar_prefetch = 0 : i64, scratch_operands = 0 : i64, tpu.core_type = #tpu.core_type<tc>} {
    %c0 = arith.constant 0 : index
    %c0_0 = arith.constant 0 : index
    %0 = vector.load %arg0[%c0, %c0_0] : memref<16x32xf32, #tpu.memory_space<vmem>>, vector<16x32xf32>
    %c0_1 = arith.constant 0 : index
    %c0_2 = arith.constant 0 : index
    %1 = vector.load %arg3[%c0_1, %c0_2] : memref<1x32xf32, #tpu.memory_space<vmem>>, vector<1x32xf32>
    %c0_3 = arith.constant 0 : index
    %c0_4 = arith.constant 0 : index
    %2 = vector.load %arg4[%c0_3, %c0_4] : memref<1x32xf32, #tpu.memory_space<vmem>>, vector<1x32xf32>
    %cst = arith.constant dense<0.000000e+00> : vector<16xf32>
    %3 = vector.multi_reduction <add>, %0, %cst [1] : vector<16x32xf32> to vector<16xf32>
    %4 = vector.shape_cast %3 : vector<16xf32> to vector<16x1xf32>
    %cst_5 = arith.constant 3.200000e+01 : f32
    %5 = vector.broadcast %cst_5 : f32 to vector<16x1xf32>
    %6 = arith.divf %4, %5 : vector<16x1xf32>
    %7 = vector.broadcast %6 : vector<16x1xf32> to vector<16x32xf32>
    %8 = arith.subf %0, %7 : vector<16x32xf32>
    %9 = vector.broadcast %6 : vector<16x1xf32> to vector<16x32xf32>
    %10 = arith.subf %0, %9 : vector<16x32xf32>
    %11 = arith.mulf %8, %10 : vector<16x32xf32>
    %cst_6 = arith.constant dense<0.000000e+00> : vector<16xf32>
    %12 = vector.multi_reduction <add>, %11, %cst_6 [1] : vector<16x32xf32> to vector<16xf32>
    %13 = vector.shape_cast %12 : vector<16xf32> to vector<16x1xf32>
    %cst_7 = arith.constant 3.200000e+01 : f32
    %14 = vector.broadcast %cst_7 : f32 to vector<16x1xf32>
    %15 = arith.divf %13, %14 : vector<16x1xf32>
    %16 = vector.broadcast %6 : vector<16x1xf32> to vector<16x32xf32>
    %17 = arith.subf %0, %16 : vector<16x32xf32>
    %cst_8 = arith.constant 9.99999974E-6 : f32
    %18 = vector.broadcast %cst_8 : f32 to vector<16x1xf32>
    %19 = arith.addf %15, %18 : vector<16x1xf32>
    %20 = math.rsqrt %19 : vector<16x1xf32>
    %21 = vector.broadcast %20 : vector<16x1xf32> to vector<16x32xf32>
    %22 = arith.mulf %17, %21 : vector<16x32xf32>
    %23 = vector.broadcast %1 : vector<1x32xf32> to vector<16x32xf32>
    %24 = arith.mulf %22, %23 : vector<16x32xf32>
    %25 = vector.broadcast %2 : vector<1x32xf32> to vector<16x32xf32>
    %26 = arith.addf %24, %25 : vector<16x32xf32>
    %c0_9 = arith.constant 0 : index
    %c0_10 = arith.constant 0 : index
    %27 = vector.load %arg1[%c0_9, %c0_10] : memref<32x16xf32, #tpu.memory_space<vmem>>, vector<32x16xf32>
    %c0_11 = arith.constant 0 : index
    %c0_12 = arith.constant 0 : index
    %28 = vector.load %arg5[%c0_11, %c0_12] : memref<32x1xf32, #tpu.memory_space<vmem>>, vector<32x1xf32>
    %c0_13 = arith.constant 0 : index
    %c0_14 = arith.constant 0 : index
    %29 = vector.load %arg6[%c0_13, %c0_14] : memref<32x1xf32, #tpu.memory_space<vmem>>, vector<32x1xf32>
    %cst_15 = arith.constant dense<0.000000e+00> : vector<16xf32>
    %30 = vector.multi_reduction <add>, %27, %cst_15 [0] : vector<32x16xf32> to vector<16xf32>
    %31 = vector.shape_cast %30 : vector<16xf32> to vector<1x16xf32>
    %cst_16 = arith.constant 3.200000e+01 : f32
    %32 = vector.broadcast %cst_16 : f32 to vector<1x16xf32>
    %33 = arith.divf %31, %32 : vector<1x16xf32>
    %34 = vector.broadcast %33 : vector<1x16xf32> to vector<32x16xf32>
    %35 = arith.subf %27, %34 : vector<32x16xf32>
    %36 = vector.broadcast %33 : vector<1x16xf32> to vector<32x16xf32>
    %37 = arith.subf %27, %36 : vector<32x16xf32>
    %38 = arith.mulf %35, %37 : vector<32x16xf32>
    %cst_17 = arith.constant dense<0.000000e+00> : vector<16xf32>
    %39 = vector.multi_reduction <add>, %38, %cst_17 [0] : vector<32x16xf32> to vector<16xf32>
    %40 = vector.shape_cast %39 : vector<16xf32> to vector<1x16xf32>
    %cst_18 = arith.constant 3.200000e+01 : f32
    %41 = vector.broadcast %cst_18 : f32 to vector<1x16xf32>
    %42 = arith.divf %40, %41 : vector<1x16xf32>
    %43 = vector.broadcast %33 : vector<1x16xf32> to vector<32x16xf32>
    %44 = arith.subf %27, %43 : vector<32x16xf32>
    %cst_19 = arith.constant 9.99999974E-6 : f32
    %45 = vector.broadcast %cst_19 : f32 to vector<1x16xf32>
    %46 = arith.addf %42, %45 : vector<1x16xf32>
    %47 = math.rsqrt %46 : vector<1x16xf32>
    %48 = vector.broadcast %47 : vector<1x16xf32> to vector<32x16xf32>
    %49 = arith.mulf %44, %48 : vector<32x16xf32>
    %50 = vector.broadcast %28 : vector<32x1xf32> to vector<32x16xf32>
    %51 = arith.mulf %49, %50 : vector<32x16xf32>
    %52 = vector.broadcast %29 : vector<32x1xf32> to vector<32x16xf32>
    %53 = arith.addf %51, %52 : vector<32x16xf32>
    %c0_20 = arith.constant 0 : index
    %c0_21 = arith.constant 0 : index
    %54 = vector.load %arg2[%c0_20, %c0_21] : memref<64x32xf32, #tpu.memory_space<vmem>>, vector<64x32xf32>
    %cst_22 = arith.constant dense<0.000000e+00> : vector<16x64xf32>
    %55 = tpu.matmul %26, %54, %cst_22 {dimension_numbers = #tpu.dot_dimension_numbers<[1], [1], [0], [0], [0, 0, 1, 0], [], []>} : vector<16x32xf32>, vector<64x32xf32>, vector<16x64xf32> -> vector<16x64xf32>
    %56 = arith.mulf %26, %26 : vector<16x32xf32>
    %cst_23 = arith.constant dense<0.000000e+00> : vector<16xf32>
    %57 = vector.multi_reduction <add>, %56, %cst_23 [1] : vector<16x32xf32> to vector<16xf32>
    %58 = vector.shape_cast %57 : vector<16xf32> to vector<16x1xf32>
    %cst_24 = arith.constant 0.0883883461 : f32
    %59 = vector.broadcast %cst_24 : f32 to vector<16x1xf32>
    %60 = arith.mulf %58, %59 : vector<16x1xf32>
    %cst_25 = arith.constant dense<0xFF800000> : vector<16xf32>
    %61 = vector.multi_reduction <maximumf>, %55, %cst_25 [1] : vector<16x64xf32> to vector<16xf32>
    %62 = vector.shape_cast %61 : vector<16xf32> to vector<16x1xf32>
    %cst_26 = arith.constant dense<0xFF800000> : vector<1xf32>
    %63 = vector.multi_reduction <maximumf>, %62, %cst_26 [0] : vector<16x1xf32> to vector<1xf32>
    %64 = vector.shape_cast %63 : vector<1xf32> to vector<1x1xf32>
    %65 = arith.addf %60, %62 : vector<16x1xf32>
    %66 = vector.broadcast %65 : vector<16x1xf32> to vector<16x64xf32>
    %67 = arith.subf %55, %66 : vector<16x64xf32>
    %68 = math.exp %67 : vector<16x64xf32>
    %cst_27 = arith.constant 9.99999974E-5 : f32
    %69 = vector.broadcast %cst_27 : f32 to vector<16x64xf32>
    %70 = arith.addf %68, %69 : vector<16x64xf32>
    %71 = vector.broadcast %64 : vector<1x1xf32> to vector<16x1xf32>
    %72 = arith.subf %62, %71 : vector<16x1xf32>
    %73 = math.exp %72 : vector<16x1xf32>
    %74 = vector.broadcast %73 : vector<16x1xf32> to vector<16x64xf32>
    %75 = arith.mulf %68, %74 : vector<16x64xf32>
    %cst_28 = arith.constant 9.99999974E-5 : f32
    %76 = vector.broadcast %cst_28 : f32 to vector<16x64xf32>
    %77 = arith.addf %75, %76 : vector<16x64xf32>
    %cst_29 = arith.constant dense<0.000000e+00> : vector<64xf32>
    %78 = vector.multi_reduction <add>, %77, %cst_29 [0] : vector<16x64xf32> to vector<64xf32>
    %79 = vector.shape_cast %78 : vector<64xf32> to vector<1x64xf32>
    %80 = vector.broadcast %79 : vector<1x64xf32> to vector<16x64xf32>
    %81 = arith.mulf %70, %80 : vector<16x64xf32>
    %cst_30 = arith.constant dense<0.000000e+00> : vector<16xf32>
    %82 = vector.multi_reduction <add>, %81, %cst_30 [1] : vector<16x64xf32> to vector<16xf32>
    %83 = vector.shape_cast %82 : vector<16xf32> to vector<16x1xf32>
    %84 = tpu.reciprocal %83 {approx = true} : vector<16x1xf32> -> vector<16x1xf32>
    %85 = arith.mulf %83, %84 : vector<16x1xf32>
    %cst_31 = arith.constant 2.000000e+00 : f32
    %86 = vector.broadcast %cst_31 : f32 to vector<16x1xf32>
    %87 = arith.subf %86, %85 : vector<16x1xf32>
    %88 = arith.mulf %84, %87 : vector<16x1xf32>
    %cst_32 = arith.constant dense<0.000000e+00> : vector<32x64xf32>
    %89 = tpu.matmul %53, %77, %cst_32 {dimension_numbers = #tpu.dot_dimension_numbers<[1], [0], [0], [1], [0, 0, 1, 1], [], []>} : vector<32x16xf32>, vector<16x64xf32>, vector<32x64xf32> -> vector<32x64xf32>
    %cst_33 = arith.constant dense<0.000000e+00> : vector<16x32xf32>
    %90 = tpu.matmul %70, %89, %cst_33 {dimension_numbers = #tpu.dot_dimension_numbers<[1], [1], [0], [0], [0, 0, 1, 0], [], []>} : vector<16x64xf32>, vector<32x64xf32>, vector<16x32xf32> -> vector<16x32xf32>
    %91 = vector.broadcast %88 : vector<16x1xf32> to vector<16x32xf32>
    %92 = arith.mulf %90, %91 : vector<16x32xf32>
    %93 = arith.addf %92, %0 : vector<16x32xf32>
    %c0_34 = arith.constant 0 : index
    %c0_35 = arith.constant 0 : index
    %94 = vector.load %arg7[%c0_34, %c0_35] : memref<1x32xf32, #tpu.memory_space<vmem>>, vector<1x32xf32>
    %c0_36 = arith.constant 0 : index
    %c0_37 = arith.constant 0 : index
    %95 = vector.load %arg8[%c0_36, %c0_37] : memref<1x32xf32, #tpu.memory_space<vmem>>, vector<1x32xf32>
    %cst_38 = arith.constant dense<0.000000e+00> : vector<16xf32>
    %96 = vector.multi_reduction <add>, %93, %cst_38 [1] : vector<16x32xf32> to vector<16xf32>
    %97 = vector.shape_cast %96 : vector<16xf32> to vector<16x1xf32>
    %cst_39 = arith.constant 3.200000e+01 : f32
    %98 = vector.broadcast %cst_39 : f32 to vector<16x1xf32>
    %99 = arith.divf %97, %98 : vector<16x1xf32>
    %100 = vector.broadcast %99 : vector<16x1xf32> to vector<16x32xf32>
    %101 = arith.subf %93, %100 : vector<16x32xf32>
    %102 = vector.broadcast %99 : vector<16x1xf32> to vector<16x32xf32>
    %103 = arith.subf %93, %102 : vector<16x32xf32>
    %104 = arith.mulf %101, %103 : vector<16x32xf32>
    %cst_40 = arith.constant dense<0.000000e+00> : vector<16xf32>
    %105 = vector.multi_reduction <add>, %104, %cst_40 [1] : vector<16x32xf32> to vector<16xf32>
    %106 = vector.shape_cast %105 : vector<16xf32> to vector<16x1xf32>
    %cst_41 = arith.constant 3.200000e+01 : f32
    %107 = vector.broadcast %cst_41 : f32 to vector<16x1xf32>
    %108 = arith.divf %106, %107 : vector<16x1xf32>
    %109 = vector.broadcast %99 : vector<16x1xf32> to vector<16x32xf32>
    %110 = arith.subf %93, %109 : vector<16x32xf32>
    %cst_42 = arith.constant 9.99999974E-6 : f32
    %111 = vector.broadcast %cst_42 : f32 to vector<16x1xf32>
    %112 = arith.addf %108, %111 : vector<16x1xf32>
    %113 = math.rsqrt %112 : vector<16x1xf32>
    %114 = vector.broadcast %113 : vector<16x1xf32> to vector<16x32xf32>
    %115 = arith.mulf %110, %114 : vector<16x32xf32>
    %116 = vector.broadcast %94 : vector<1x32xf32> to vector<16x32xf32>
    %117 = arith.mulf %115, %116 : vector<16x32xf32>
    %118 = vector.broadcast %95 : vector<1x32xf32> to vector<16x32xf32>
    %119 = arith.addf %117, %118 : vector<16x32xf32>
    %c0_43 = arith.constant 0 : index
    %c0_44 = arith.constant 0 : index
    %120 = vector.load %arg9[%c0_43, %c0_44] : memref<32x64xf32, #tpu.memory_space<vmem>>, vector<32x64xf32>
    %cst_45 = arith.constant dense<0.000000e+00> : vector<16x64xf32>
    %121 = tpu.matmul %119, %120, %cst_45 {dimension_numbers = #tpu.dot_dimension_numbers<[1], [0], [0], [1], [0, 0, 1, 1], [], []>} : vector<16x32xf32>, vector<32x64xf32>, vector<16x64xf32> -> vector<16x64xf32>
    %c0_46 = arith.constant 0 : index
    %c0_47 = arith.constant 0 : index
    %122 = vector.load %arg10[%c0_46, %c0_47] : memref<1x64xf32, #tpu.memory_space<vmem>>, vector<1x64xf32>
    %123 = vector.broadcast %122 : vector<1x64xf32> to vector<16x64xf32>
    %124 = arith.addf %121, %123 : vector<16x64xf32>
    %cst_48 = arith.constant 5.000000e-01 : f32
    %125 = vector.broadcast %cst_48 : f32 to vector<16x64xf32>
    %126 = arith.mulf %125, %124 : vector<16x64xf32>
    %cst_49 = arith.constant 4.471500e-02 : f32
    %127 = vector.broadcast %cst_49 : f32 to vector<16x64xf32>
    %128 = arith.mulf %127, %124 : vector<16x64xf32>
    %129 = arith.mulf %128, %124 : vector<16x64xf32>
    %130 = arith.mulf %129, %124 : vector<16x64xf32>
    %131 = arith.addf %124, %130 : vector<16x64xf32>
    %cst_50 = arith.constant 0.797884583 : f32
    %132 = vector.broadcast %cst_50 : f32 to vector<16x64xf32>
    %133 = arith.mulf %132, %131 : vector<16x64xf32>
    %134 = math.tanh %133 : vector<16x64xf32>
    %cst_51 = arith.constant 1.000000e+00 : f32
    %135 = vector.broadcast %cst_51 : f32 to vector<16x64xf32>
    %136 = arith.addf %135, %134 : vector<16x64xf32>
    %137 = arith.mulf %126, %136 : vector<16x64xf32>
    %c0_52 = arith.constant 0 : index
    %c0_53 = arith.constant 0 : index
    %138 = vector.load %arg11[%c0_52, %c0_53] : memref<64x32xf32, #tpu.memory_space<vmem>>, vector<64x32xf32>
    %cst_54 = arith.constant dense<0.000000e+00> : vector<16x32xf32>
    %139 = tpu.matmul %137, %138, %cst_54 {dimension_numbers = #tpu.dot_dimension_numbers<[1], [0], [0], [1], [0, 0, 1, 1], [], []>} : vector<16x64xf32>, vector<64x32xf32>, vector<16x32xf32> -> vector<16x32xf32>
    %c0_55 = arith.constant 0 : index
    %c0_56 = arith.constant 0 : index
    %140 = vector.load %arg12[%c0_55, %c0_56] : memref<1x32xf32, #tpu.memory_space<vmem>>, vector<1x32xf32>
    %141 = vector.broadcast %140 : vector<1x32xf32> to vector<16x32xf32>
    %142 = arith.addf %139, %141 : vector<16x32xf32>
    %143 = arith.addf %142, %93 : vector<16x32xf32>
    %144 = tpu.concatenate %143, %143, %143, %143 in 1 : vector<16x32xf32>, vector<16x32xf32>, vector<16x32xf32>, vector<16x32xf32> -> vector<16x128xf32>
    %c0_57 = arith.constant 0 : index
    %c0_58 = arith.constant 0 : index
    %145 = vector.load %arg13[%c0_57, %c0_58] : memref<16x128xf32, #tpu.memory_space<vmem>>, vector<16x128xf32>
    tpu.vector_store %arg13[%c0_57, %c0_58], %144 {strides = array<i32>} : memref<16x128xf32, #tpu.memory_space<vmem>>, vector<16x128xf32>,
    return
  }
}

</mosaic_0001>

<bundles_post_ra>
// kernel: tpu_custom_call.1
= control target key start
LH: loop header
LB: loop body
LE: loop exit
PB: predicated region body
PF: predicated region fallthrough
CT: control target
= control target key end

     0   :  { %vm49_vm0 = vcmask 261120   ;;  %s1446_s0 = inlined_call_operand.vmem [shape: f32[16,32], index: 0, kind: input, shape index: {}]   ;;  %s1447_s1 = inlined_call_operand.vmem [shape: f32[32,16], index: 1, kind: input, shape index: {}]   ;;  %s1448_s2 = inlined_call_operand.vmem [shape: f32[64,32], index: 2, kind: input, shape index: {}]   ;;  %s1449_s3 = inlined_call_operand.vmem [shape: f32[1,32], index: 3, kind: input, shape index: {}]   ;;  %s1450_s4 = inlined_call_operand.vmem [shape: f32[1,32], index: 4, kind: input, shape index: {}]   ;;  %s1451_s5 = inlined_call_operand.vmem [shape: f32[32,1], index: 5, kind: input, shape index: {}]   ;;  %s1452_s6 = inlined_call_operand.vmem [shape: f32[32,1], index: 6, kind: input, shape index: {}]   ;;  %s1453_s7 = inlined_call_operand.vmem [shape: f32[1,32], index: 7, kind: input, shape index: {}]   ;;  %s1454_s8 = inlined_call_operand.vmem [shape: f32[1,32], index: 8, kind: input, shape index: {}]   ;;  %s1455_s9 = inlined_call_operand.vmem [shape: f32[32,64], index: 9, kind: input, shape index: {}]   ;;  %s1456_s10 = inlined_call_operand.vmem [shape: f32[1,64], index: 10, kind: input, shape index: {}]   ;;  %s1457_s11 = inlined_call_operand.vmem [shape: f32[64,32], index: 11, kind: input, shape index: {}]   ;;  %s1458_s12 = inlined_call_operand.vmem [shape: f32[1,32], index: 12, kind: input, shape index: {}]   ;;  %s1459_s13 = inlined_call_operand.hbm [shape: f32[16,128], index: 13, kind: output, shape index: {}]  }
   0x1   :  { %v1210_v0 = vld [vmem:[%s1446_s0] sm:$0xff]  ;;  %v1215_v1 = vld [vmem:[%s1446_s0 + $0x8] sm:$0xff] }
   0x2   :  { %18 = vsyncpa [#allocation3], 0  ;;  %v50_v2 = vsel %vm49_vm0, %v1210_v0, 0.0  ;;  %v53_v3 = vsel %vm49_vm0, %v1215_v1, 0.0  ;;  %v196_v4 = vld [vmem:[%s1448_s2] sm:$0xff]  ;;  %v197_v5 = vld [vmem:[%s1448_s2 + $0x8] sm:$0xff] }
   0x3   :  { %51 = vadd.xlane.f32.xlu0 %v50_v2  ;;  %vm1229_vm1 = vmpackc.low %vm49_vm0, %vm49_vm0  ;;  %v1007_v7 = vpack.c.bf16 %v197_v5, %v196_v4  ;;  %v198_v18 = vld [vmem:[%s1448_s2 + $0x10] sm:$0xff]  ;;  %v199_v19 = vld [vmem:[%s1448_s2 + $0x18] sm:$0xff]  ;;  %v1130_v43 = vmov 0   ;;  %vm319_vm2 = vcmask 523264   ;;  %vm105_vm3 = vcmask 130048   ;;  %s1131_s14 = smov 64  }
   0x4   :  { %v1013_v20 = vpack.c.bf16 %v199_v19, %v198_v18  ;;  %v200_v21 = vld [vmem:[%s1448_s2 + $0x20] sm:$0xff]  ;;  %v201_v22 = vld [vmem:[%s1448_s2 + $0x28] sm:$0xff]  ;;  %v202_v24 = vld [vmem:[%s1448_s2 + $0x30] sm:$0xff]  ;;  %1079 = vset.pattern.permute.xlu1 %v1130_v43  ;;  %1078 = vset.pattern.permute.xlu0 %v1130_v43  ;;  %s1132_s15 = smov 32   ;;  %s1133_s0 = smov 96   ;;  %vm848_vm5 = vcmask 785408  }
   0x5   :  { %1009 = vmatprep.subr.msk.bf16.mxu0 %vm1229_vm1, %v1007_v7  ;;  %v1019_v23 = vpack.c.bf16 %v201_v22, %v200_v21  ;;  %v203_v25 = vld [vmem:[%s1448_s2 + $0x38] sm:$0xff]  ;;  %v869_v34 = vld [vmem:[%s1449_s3] ss:$0 sm:$0xff]  ;;  %v98_v52 = vld [vmem:[%s1451_s5 + $0x8] sm:$0xff] }
   0x6   :  { %1012 = vmatpush3.bf16.xpose.msk.msra.mxu0 %vm1229_vm1, %v1007_v7  ;;  %v1025_v26 = vpack.c.bf16 %v203_v25, %v202_v24  ;;  %v870_v36 = vld [vmem:[%s1450_s4] ss:$0 sm:$0xff]  ;;  %v102_v55 = vld [vmem:[%s1452_s6 + $0x8] sm:$0xff]  ;;  %v99_v56 = vld [vmem:[%s1451_s5 + $0x10] sm:$0xff] }
   0x7   :  { %54 = vadd.xlane.f32.xlu0 %v53_v3  ;;  %1015 = vmatprep.subr.msk.bf16.mxu0 %vm1229_vm1, %v1013_v20  ;;  %v101_v53 = vld [vmem:[%s1452_s6] sm:$0xff]  ;;  %v100_v57 = vld [vmem:[%s1451_s5 + $0x18] sm:$0xff]  ;;  %v94_v59 = vld [vmem:[%s1447_s1 + $0x8] sm:$0xff] }
   0x8   :  { %v97_v54 = vld [vmem:[%s1451_s5] sm:$0xff]  ;;  %v103_v60 = vld [vmem:[%s1452_s6 + $0x10] sm:$0xff]  ;;  %v107_v62 = vsel %vm105_vm3, %v94_v59, 0.0  ;;  %v104_v2 = vld [vmem:[%s1452_s6 + $0x18] sm:$0xff] }
   0x9   :  { %v93_v58 = vld [vmem:[%s1447_s1] sm:$0xff]  ;;  %v95_v63 = vld [vmem:[%s1447_s1 + $0x10] sm:$0xff]  ;;  %v96_v5 = vld [vmem:[%s1447_s1 + $0x18] sm:$0xff] }
   0xa   :  { %v106_v61 = vsel %vm105_vm3, %v93_v58, 0.0  ;;  %v109_v4 = vsel %vm105_vm3, %v95_v63, 0.0  ;;  %v111_v7 = vsel %vm105_vm3, %v96_v5, 0.0  ;;  %vm1036_vm4 = vmpackc.low %vm319_vm2, %vm319_vm2 }
   0xb   :  { %v108_v3 = vadd.f32 %v107_v62, %v106_v61 }
   0xd   :  { %v110_v6 = vadd.f32 %v109_v4, %v108_v3 }
   0xe   :  { %1018 = vmatpush3.bf16.xpose.msk.msra.mxu0 %vm1229_vm1, %v1013_v20 }
   0xf   :  { %1021 = vmatprep.subr.msk.bf16.mxu0 %vm1229_vm1, %v1019_v23 }
  0x16   :  { %1024 = vmatpush3.bf16.xpose.msk.msra.mxu0 %vm1229_vm1, %v1019_v23 }
  0x17   :  { %1027 = vmatprep.subr.msk.bf16.mxu0 %vm1229_vm1, %v1025_v26 }
  0x1e   :  { %1030 = vmatpush3.bf16.xpose.msk.msra.mxu0 %vm1229_vm1, %v1025_v26 }
  0x90   :  { %v52_v8 = vpop.xlane.xlu0 %51 }
  0x91   :  { %v57_v9 = vmul.f32 0.03125, %v52_v8  ;;  %v112_v8 = vadd.f32 %v111_v7, %v110_v6 }
  0x93   :  { %v59_v10 = vsub.f32 %v1210_v0, %v57_v9  ;;  %v113_v9 = vrot.slane %v112_v8, 4 }
  0x94   :  { %v55_v11 = vpop.xlane.xlu0 %54 }
  0x95   :  { %v58_v12 = vmul.f32 0.03125, %v55_v11  ;;  %v61_v13 = vmul.f32 %v59_v10, %v59_v10 }
  0x97   :  { %v60_v14 = vsub.f32 %v1215_v1, %v58_v12  ;;  %v63_v15 = vsel %vm49_vm0, %v61_v13, 0.0 }
  0x98   :  { %64 = vadd.xlane.f32.xlu1 %v63_v15 }
  0x99   :  { %v62_v16 = vmul.f32 %v60_v14, %v60_v14 }
  0x9b   :  { %v66_v17 = vsel %vm49_vm0, %v62_v16, 0.0 }
  0x9c   :  { %67 = vadd.xlane.f32.xlu1 %v66_v17 }
 0x125   :  { %v65_v27 = vpop.xlane.xlu1 %64 }
 0x126   :  { %v69_v28 = vmul.f32 0.03125, %v65_v27 }
 0x128   :  { %v71_v29 = vadd.f32 1e-05, %v69_v28 }
 0x129   :  { %v68_v30 = vpop.xlane.xlu1 %67 }
 0x12a   :  { %1080 = vrsqrt.f32 %v71_v29  ;;  %v70_v31 = vmul.f32 0.03125, %v68_v30 }
 0x12c   :  { %v72_v32 = vadd.f32 1e-05, %v70_v31 }
 0x12e   :  { %1082 = vrsqrt.f32 %v72_v32 }
 0x134   :  { %v1081_v33 = vpop.eup %1080 }
 0x135   :  { %v75_v35 = vmul.f32 %v1081_v33, %v59_v10  ;;  %v114_v10 = vadd.f32 %v113_v9, %v112_v8 }
 0x137   :  { %v83_v37 = vmul.f32 %v869_v34, %v75_v35  ;;  %v115_v11 = vrot.slane %v114_v10, 2 }
 0x138   :  { %v1083_v38 = vpop.eup %1082 }
 0x139   :  { %v76_v39 = vmul.f32 %v1083_v38, %v60_v14  ;;  %v91_v40 = vadd.f32 %v870_v36, %v83_v37  ;;  %v116_v12 = vadd.f32 %v115_v11, %v114_v10 }
 0x13b   :  { %v84_v41 = vmul.f32 %v869_v34, %v76_v39  ;;  %953 = vmatprep.mubr.msk.f32.mxu0 %vm49_vm0, %v91_v40  ;;  %v309_v49 = vmul.f32 %v91_v40, %v91_v40  ;;  %v117_v13 = vrot.slane %v116_v12, 1 }
 0x13d   :  { %v92_v42 = vadd.f32 %v870_v36, %v84_v41  ;;  %v311_v51 = vsel %vm49_vm0, %v309_v49, 0.0  ;;  %v118_v14 = vadd.f32 %v117_v13, %v116_v12 }
 0x13f   :  { %954 = vmatmul.mubr.msk.f32.vlgmr.msra.gmra.mrb[0].mxu0 %vm49_vm0, %v92_v42  ;;  %v310_v47 = vmul.f32 %v92_v42, %v92_v42  ;;  %v119_v15 = vmul.f32 0.03125, %v118_v14 }
 0x141   :  { %v314_v50 = vsel %vm49_vm0, %v310_v47, 0.0  ;;  %v120_v16 = vsub.f32 %v93_v58, %v119_v15  ;;  %v1329_v17 = vsub.f32 %v94_v59, %v119_v15  ;;  %v1331_v18 = vsub.f32 %v95_v63, %v119_v15 }
 0x142   :  { %v1335_v21 = vsub.f32 %v96_v5, %v119_v15 }
 0x143   :  { %v124_v19 = vmul.f32 %v120_v16, %v120_v16  ;;  %v125_v20 = vmul.f32 %v1329_v17, %v1329_v17  ;;  %v126_v22 = vmul.f32 %v1331_v18, %v1331_v18 }
 0x144   :  { %v127_v26 = vmul.f32 %v1335_v21, %v1335_v21 }
 0x145   :  { %v128_v23 = vsel %vm105_vm3, %v124_v19, 0.0  ;;  %v129_v24 = vsel %vm105_vm3, %v125_v20, 0.0  ;;  %v131_v27 = vsel %vm105_vm3, %v126_v22, 0.0 }
 0x146   :  { %v130_v25 = vadd.f32 %v129_v24, %v128_v23  ;;  %v133_v29 = vsel %vm105_vm3, %v127_v26, 0.0 }
 0x148   :  { %v132_v28 = vadd.f32 %v131_v27, %v130_v25 }
 0x14a   :  { %v134_v30 = vadd.f32 %v133_v29, %v132_v28 }
 0x14c   :  { %v135_v31 = vrot.slane %v134_v30, 4 }
 0x14e   :  { %v136_v32 = vadd.f32 %v135_v31, %v134_v30 }
 0x150   :  { %v137_v33 = vrot.slane %v136_v32, 2 }
 0x152   :  { %v138_v34 = vadd.f32 %v137_v33, %v136_v32 }
 0x154   :  { %v139_v35 = vrot.slane %v138_v34, 1 }
 0x156   :  { %v140_v36 = vadd.f32 %v139_v35, %v138_v34 }
 0x158   :  { %v141_v37 = vmul.f32 0.03125, %v140_v36 }
 0x15a   :  { %v142_v38 = vadd.f32 1e-05, %v141_v37 }
 0x15c   :  { %1084 = vrsqrt.f32 %v142_v38 }
 0x212   :  { %v1279_v44 = vpop.f32.mrb[0].mxu0 }
 0x213   :  { %v1281_v45 = vpop.f32.mrb[1].mxu0  ;;  %v323_v46 = vsel %vm319_vm2, %v1279_v44, -inf }
 0x214   :  { %324 = vmax.xlane.f32.xlu1 %v323_v46  ;;  %v320_v48 = vsel %vm319_vm2, %v1281_v45, -inf }
 0x215   :  { %321 = vmax.xlane.f32.xlu0 %v320_v48 }
 0x218   :  { %315 = vadd.xlane.f32.xlu1 %v314_v50  ;;  %v1085_v50 = vpop.eup %1084 }
 0x219   :  { %312 = vadd.xlane.f32.xlu0 %v311_v51  ;;  %v146_v23 = vmul.f32 %v1085_v50, %v1331_v18  ;;  %v147_v30 = vmul.f32 %v1085_v50, %v1335_v21 }
 0x229   :  { %155 = vperm.xlu1 %1079, %v98_v52  }
 0x22d   :  { %174 = vperm.xlu1 %1079, %v101_v53  }
 0x22f   :  { %150 = vperm.xlu0 %1078, %v97_v54  }
 0x231   :  { %179 = vperm.xlu1 %1079, %v102_v55  }
 0x235   :  { %160 = vperm.xlu1 %1079, %v99_v56  }
 0x239   :  { %165 = vperm.xlu1 %1079, %v100_v57   ;;  %v144_v57 = vmul.f32 %v1085_v50, %v120_v16  ;;  %v145_v16 = vmul.f32 %v1085_v50, %v1329_v17 }
 0x23d   :  { %184 = vperm.xlu1 %1079, %v103_v60  }
 0x241   :  { %189 = vperm.xlu1 %1079, %v104_v2  }
 0x2a1   :  { %v325_v39 = vpop.xlane.xlu1 %324 }
 0x2a2   :  { %v322_v40 = vpop.xlane.xlu0 %321 }
 0x2a3   :  { %v326_v41 = vmax.f32 %v322_v40, %v325_v39 }
 0x2a5   :  { %v327_v42 = vrot.slane %v326_v41, 4  ;;  %v316_v43 = vpop.xlane.xlu1 %315 }
 0x2a6   :  { %v318_v46 = vmul.f32 0.088388346, %v316_v43  ;;  %v313_v47 = vpop.xlane.xlu0 %312 }
 0x2a7   :  { %v328_v48 = vmax.f32 %v326_v41, %v327_v42  ;;  %v317_v49 = vmul.f32 0.088388346, %v313_v47 }
 0x2a8   :  { %v334_v51 = vadd.f32 %v325_v39, %v318_v46 }
 0x2a9   :  { %v329_v52 = vrot.slane %v328_v48, 2  ;;  %v333_v53 = vadd.f32 %v322_v40, %v317_v49  ;;  %v156_v54 = vpop.permute.xlu1 %155 }
 0x2aa   :  { %v336_v58 = vsub.f32 %v1279_v44, %v334_v51  ;;  %v169_v26 = vmul.f32 %v156_v54, %v145_v16  ;;  %v617_v16 = vld [vmem:[%s1455_s9 + $0x8] sm:$0xff] }
 0x2ab   :  { %v330_v55 = vmax.f32 %v328_v48, %v329_v52  ;;  %v335_v56 = vsub.f32 %v1281_v45, %v333_v53 }
 0x2ac   :  { %v339_v3 = vmul.f32 1.442695, %v336_v58 }
 0x2ad   :  { %v331_v59 = vrot.slane %v330_v55, 1  ;;  %v337_v60 = vmul.f32 1.442695, %v335_v56  ;;  %v175_v61 = vpop.permute.xlu1 %174 }
 0x2ae   :  { %v151_v62 = vpop.permute.xlu0 %150 }
 0x2af   :  { %v332_v63 = vmax.f32 %v330_v55, %v331_v59  ;;  %1086 = vpow2.f32 %v337_v60  ;;  %v168_v2 = vmul.f32 %v151_v62, %v144_v57 }
 0x2b0   :  { %1088 = vpow2.f32 %v339_v3 }
 0x2b1   :  { %v343_v4 = vsub.f32 %v322_v40, %v332_v63  ;;  %v344_v5 = vsub.f32 %v325_v39, %v332_v63  ;;  %v192_v6 = vadd.f32 %v175_v61, %v168_v2  ;;  %v180_v7 = vpop.permute.xlu1 %179 }
 0x2b2   :  { %v193_v17 = vadd.f32 %v180_v7, %v169_v26 }
 0x2b3   :  { %v345_v8 = vmul.f32 1.442695, %v343_v4  ;;  %v347_v9 = vmul.f32 1.442695, %v344_v5  ;;  %960 = vmatprep.mubr.msk.f32.mxu0 %vm105_vm3, %v192_v6 }
 0x2b5   :  { %1090 = vpow2.f32 %v345_v8  ;;  %v161_v44 = vpop.permute.xlu1 %160 }
 0x2b6   :  { %1092 = vpow2.f32 %v347_v9  ;;  %v170_v31 = vmul.f32 %v161_v44, %v146_v23 }
 0x2b9   :  { %v1087_v45 = vpop.eup %1086  ;;  %v166_v12 = vpop.permute.xlu1 %165 }
 0x2ba   :  { %v341_v10 = vadd.f32 0.0001, %v1087_v45  ;;  %v1089_v11 = vpop.eup %1088  ;;  %v171_v36 = vmul.f32 %v166_v12, %v147_v30 }
 0x2bb   :  { %v342_v21 = vadd.f32 0.0001, %v1089_v11 }
 0x2bc   :  { %974 = vmatprep.mubr.msk.f32.mxu1 %vm319_vm2, %v341_v10 }
 0x2bd   :  { %v185_v24 = vpop.permute.xlu1 %184 }
 0x2be   :  { %v194_v33 = vadd.f32 %v185_v24, %v170_v31  ;;  %v891_v31 = vld [vmem:[%s1453_s7] ss:$0 sm:$0xff] }
 0x2bf   :  { %v1091_v13 = vpop.eup %1090 }
 0x2c0   :  { %v1093_v14 = vpop.eup %1092  ;;  %v349_v15 = vmul.f32 %v1091_v13, %v1087_v45 }
 0x2c1   :  { %v350_v19 = vmul.f32 %v1093_v14, %v1089_v11  ;;  %v190_v34 = vpop.permute.xlu1 %189 }
 0x2c2   :  { %v351_v20 = vadd.f32 0.0001, %v349_v15  ;;  %v195_v37 = vadd.f32 %v190_v34, %v171_v36  ;;  %v616_v15 = vld [vmem:[%s1455_s9] sm:$0xff] }
 0x2c3   :  { %v352_v22 = vadd.f32 0.0001, %v350_v19  ;;  %v1047_v19 = vpack.c.bf16 %v617_v16, %v616_v15  ;;  %v892_v34 = vld [vmem:[%s1454_s8] ss:$0 sm:$0xff] }
 0x2c4   :  { %v353_v25 = vsel %vm319_vm2, %v351_v20, 0.0 }
 0x2c5   :  { %v354_v27 = vsel %vm319_vm2, %v352_v22, 0.0  ;;  %v1031_v28 = vpack.c.bf16 %v352_v22, %v351_v20  ;;  %v618_v20 = vld [vmem:[%s1455_s9 + $0x10] sm:$0xff]  ;;  %v619_v22 = vld [vmem:[%s1455_s9 + $0x18] sm:$0xff] }
 0x2c6   :  { %v355_v29 = vadd.f32 %v354_v27, %v353_v25  ;;  %v1051_v23 = vpack.c.bf16 %v619_v22, %v618_v20 }
 0x2c7   :  { %1032 = vmatprep.subr.bf16.mxu0 %v1031_v28 }
 0x2c8   :  { %1034 = vmatpush3.bf16.msra.mxu0 %v1031_v28  ;;  %v356_v32 = vrot.slane %v355_v29, 4 }
 0x2ca   :  { %v357_v35 = vadd.f32 %v356_v32, %v355_v29 }
 0x2cb   :  { %961 = vmatmul.mubr.msk.f32.vlgmr.msra.gmra.mrb[2].mxu0 %vm105_vm3, %v193_v17 }
 0x2cc   :  { %963 = vmatprep.mubr.msk.f32.mxu0 %vm105_vm3, %v194_v33  ;;  %v358_v18 = vrot.slane %v357_v35, 2 }
 0x2ce   :  { %v359_v38 = vadd.f32 %v358_v18, %v357_v35 }
 0x2cf   :  { %964 = vmatmul.mubr.msk.f32.gmra.mrb[4].mxu0 %vm105_vm3, %v195_v37 }
 0x2d0   :  { %v360_v39 = vrot.slane %v359_v38, 1 }
 0x2d2   :  { %v361_v40 = vadd.f32 %v360_v39, %v359_v38  ;;  %v726_v38 = vld [vmem:[%s1457_s11] sm:$0xff]  ;;  %v727_v39 = vld [vmem:[%s1457_s11 + $0x8] sm:$0xff] }
 0x2d4   :  { %v363_v41 = vmul.f32 %v361_v40, %v342_v21  ;;  %v362_v42 = vmul.f32 %v361_v40, %v341_v10  ;;  %v728_v40 = vld [vmem:[%s1457_s11 + $0x10] sm:$0xff] }
 0x2d6   :  { %v367_v43 = vsel %vm319_vm2, %v363_v41, 0.0  ;;  %v364_v46 = vsel %vm319_vm2, %v362_v42, 0.0  ;;  %v729_v41 = vld [vmem:[%s1457_s11 + $0x18] sm:$0xff] }
 0x2d7   :  { %368 = vadd.xlane.f32.xlu0 %v367_v43  ;;  %365 = vadd.xlane.f32.xlu1 %v364_v46  ;;  %v1059_v42 = vpack.c.bf16 %v729_v41, %v728_v40  ;;  %v730_v43 = vld [vmem:[%s1457_s11 + $0x20] sm:$0xff]  ;;  %v731_v46 = vld [vmem:[%s1457_s11 + $0x28] sm:$0xff] }
 0x364   :  { %v369_v53 = vpop.xlane.xlu0 %368  ;;  %v366_v54 = vpop.xlane.xlu1 %365 }
 0x365   :  { %1094 = vrcp.f32 %v369_v53 }
 0x366   :  { %1096 = vrcp.f32 %v366_v54 }
 0x36f   :  { %v1095_v55 = vpop.eup %1094 }
 0x370   :  { %v1097_v56 = vpop.eup %1096  ;;  %v373_v57 = vmul.f32 %v1095_v55, %v369_v53 }
 0x371   :  { %v372_v58 = vmul.f32 %v1097_v56, %v366_v54 }
 0x372   :  { %v375_v59 = vsub.f32 2.0, %v373_v57 }
 0x373   :  { %v374_v60 = vsub.f32 2.0, %v372_v58 }
 0x374   :  { %v377_v61 = vmul.f32 %v1095_v55, %v375_v59 }
 0x375   :  { %v376_v63 = vmul.f32 %v1097_v56, %v374_v60 }
 0x39e   :  { %v962_v47 = vpop.f32.mrb[2].mxu0 }
 0x39f   :  { %v456_v48 = vpop.f32.mrb[3].mxu0 }
 0x3a0   :  { %v1035_v49 = vpack.c.bf16 %v962_v47, %v456_v48  ;;  %v1063_v47 = vpack.c.bf16 %v731_v46, %v730_v43  ;;  %v732_v48 = vld [vmem:[%s1457_s11 + $0x30] sm:$0xff] }
 0x3a2   :  { %v965_v50 = vpop.f32.mrb[4].mxu0  ;;  %1037 = vmatprep.subr.msk.bf16.mxu1 %vm1036_vm4, %v1035_v49 }
 0x3a3   :  { %v466_v51 = vpop.f32.mrb[5].mxu0  ;;  %1040 = vmatpush3.bf16.xpose.msk.msra.mxu1 %vm1036_vm4, %v1035_v49  ;;  %v733_v49 = vld [vmem:[%s1457_s11 + $0x38] sm:$0xff] }
 0x3a4   :  { %v1041_v52 = vpack.c.bf16 %v965_v50, %v466_v51  ;;  %v1067_v50 = vpack.c.bf16 %v733_v49, %v732_v48  ;;  %v893_v51 = vld [vmem:[%s1456_s10] ss:$0 sm:$0xff] }
 0x3a6   :  { %1043 = vmatprep.subr.msk.bf16.mxu1 %vm1036_vm4, %v1041_v52 }
 0x3ab   :  { %1046 = vmatpush3.bf16.xpose.msk.msra.mxu1 %vm1036_vm4, %v1041_v52 }
 0x3ac   :  { %1048 = vmatprep.subr.bf16.mxu1 %v1047_v19 }
 0x3b2   :  { %975 = vmatmul.mubr.msk.f32.vlgmr.msra.gmra.mrb[0].mxu1 %vm319_vm2, %v342_v21  ;;  %v1055_v21 = vpack.c.bf16 %v727_v39, %v726_v38 }
 0x3b3   :  { %1050 = vmatpush3.bf16.msra.mxu1 %v1047_v19 }
 0x3b4   :  { %1052 = vmatprep.subr.bf16.mxu1 %v1051_v23 }
 0x3b7   :  { %1054 = vmatpush3.bf16.msra.mxu1 %v1051_v23 }
 0x3b8   :  { %1056 = vmatprep.subr.bf16.mxu1 %v1055_v21 }
 0x485   :  { %v976_v62 = vpop.f32.mrb[0].mxu1 }
 0x486   :  { %v569_v2 = vmul.f32 %v976_v62, %v377_v61  ;;  %v559_v3 = vpop.f32.mrb[1].mxu1 }
 0x487   :  { %v568_v4 = vmul.f32 %v559_v3, %v376_v63 }
 0x488   :  { %v1363_v5 = vadd.f32 %v569_v2, %v1215_v1 }
 0x489   :  { %v1366_v6 = vadd.f32 %v568_v4, %v1210_v0 }
 0x48a   :  { %v577_v7 = vsel %vm49_vm0, %v1363_v5, 0.0 }
 0x48b   :  { %578 = vadd.xlane.f32.xlu1 %v577_v7  ;;  %v574_v8 = vsel %vm49_vm0, %v1366_v6, 0.0 }
 0x48c   :  { %575 = vadd.xlane.f32.xlu0 %v574_v8 }
 0x518   :  { %v579_v9 = vpop.xlane.xlu1 %578 }
 0x519   :  { %v581_v44 = vmul.f32 0.03125, %v579_v9  ;;  %v576_v45 = vpop.xlane.xlu0 %575 }
 0x51a   :  { %v580_v10 = vmul.f32 0.03125, %v576_v45 }
 0x51b   :  { %v583_v11 = vsub.f32 %v1363_v5, %v581_v44 }
 0x51c   :  { %v582_v1 = vsub.f32 %v1366_v6, %v580_v10 }
 0x51d   :  { %v585_v12 = vmul.f32 %v583_v11, %v583_v11 }
 0x51e   :  { %v584_v13 = vmul.f32 %v582_v1, %v582_v1 }
 0x51f   :  { %v589_v0 = vsel %vm49_vm0, %v585_v12, 0.0 }
 0x520   :  { %590 = vadd.xlane.f32.xlu1 %v589_v0  ;;  %v586_v14 = vsel %vm49_vm0, %v584_v13, 0.0 }
 0x521   :  { %587 = vadd.xlane.f32.xlu0 %v586_v14 }
 0x5ad   :  { %v591_v24 = vpop.xlane.xlu1 %590 }
 0x5ae   :  { %v593_v25 = vmul.f32 0.03125, %v591_v24  ;;  %v588_v26 = vpop.xlane.xlu0 %587 }
 0x5af   :  { %v592_v27 = vmul.f32 0.03125, %v588_v26 }
 0x5b0   :  { %v595_v28 = vadd.f32 1e-05, %v593_v25 }
 0x5b1   :  { %v594_v29 = vadd.f32 1e-05, %v592_v27 }
 0x5b2   :  { %1098 = vrsqrt.f32 %v595_v28 }
 0x5b3   :  { %1100 = vrsqrt.f32 %v594_v29 }
 0x5bc   :  { %v1099_v30 = vpop.eup %1098 }
 0x5bd   :  { %v1101_v32 = vpop.eup %1100  ;;  %v599_v17 = vmul.f32 %v1099_v30, %v583_v11 }
 0x5be   :  { %v598_v33 = vmul.f32 %v1101_v32, %v582_v1  ;;  %v896_v1 = vld [vmem:[%s1458_s12] ss:$0 sm:$0xff]  ;;  %s1134_s12 = smov [#allocation2]  }
 0x5bf   :  { %v607_v35 = vmul.f32 %v891_v31, %v599_v17  ;;  %s858_s16 = sshll.u32 %s1134_s12, 4  ;;  %s859_s16 = int_to_ptr.vmem [resolvable:$true] %s858_s16 }
 0x5c0   :  { %v606_v36 = vmul.f32 %v891_v31, %v598_v33  ;;  %s1106_s17 = scalar_lea.vmem %s859_s16, 256  ;;  %p1111_p1 = scmp.lt.s32.totalorder %s859_s16, %s859_s16 }
 0x5c1   :  { %v615_v37 = vadd.f32 %v892_v34, %v607_v35  ;;  %p1107_p0 = scmp.ne.s32.totalorder %s859_s16, %s1106_s17  ;;  %p1112_p2 = scmp.lt.s32.totalorder %s1106_s17, %s1106_s17 }
 0x5c2   :  { %v614_v18 = vadd.f32 %v892_v34, %v606_v36 }
 0x5c3   :  { %p1113_p3 = por %p1112_p2, %p1111_p1 }
 0x5c4   :  { %985 = vmatprep.mubr.msk.f32.mxu1 %vm49_vm0, %v614_v18 }
 0x5c5   :  { %986 = vmatmul.mubr.msk.f32.vlgmr.msra.gmra.mrb[2].mxu1 %vm49_vm0, %v615_v37  ;;  %p1114_p4 = pnand %p1113_p3, %p1107_p0 }
 0x5c6   :  { %1058 = vmatpush3.bf16.msra.mxu1 %v1055_v21 }
 0x5c7   :  { %1060 = vmatprep.subr.bf16.mxu1 %v1059_v42 }
 0x5ca   :  { %1062 = vmatpush3.bf16.msra.mxu1 %v1059_v42 }
 0x5cb   :  { %1064 = vmatprep.subr.bf16.mxu1 %v1063_v47 }
 0x5ce   :  { %1066 = vmatpush3.bf16.msra.mxu1 %v1063_v47 }
 0x5cf   :  { %1068 = vmatprep.subr.bf16.mxu1 %v1067_v50 }
 0x5d2   :  { %1070 = vmatpush3.bf16.msra.mxu1 %v1067_v50 }
 0x698   :  { %v987_v52 = vpop.f32.mrb[2].mxu1 }
 0x699   :  { %v705_v53 = vadd.f32 %v987_v52, %v893_v51  ;;  %v699_v54 = vpop.f32.mrb[3].mxu1 }
 0x69a   :  { %v700_v55 = vadd.f32 %v893_v51, %v699_v54 }
 0x69b   :  { %v711_v56 = vmul.f32 0.044715, %v705_v53  ;;  %v709_v45 = vmul.f32 0.5, %v705_v53 }
 0x69c   :  { %v710_v57 = vmul.f32 0.044715, %v700_v55  ;;  %v708_v9 = vmul.f32 0.5, %v700_v55 }
 0x69d   :  { %v713_v58 = vmul.f32 %v711_v56, %v705_v53 }
 0x69e   :  { %v712_v59 = vmul.f32 %v710_v57, %v700_v55 }
 0x69f   :  { %v715_v60 = vmul.f32 %v713_v58, %v705_v53 }
 0x6a0   :  { %v714_v61 = vmul.f32 %v712_v59, %v700_v55 }
 0x6a1   :  { %v717_v62 = vadd.f32 %v715_v60, %v705_v53 }
 0x6a2   :  { %v716_v63 = vadd.f32 %v714_v61, %v700_v55 }
 0x6a3   :  { %v719_v2 = vmul.f32 0.7978846, %v717_v62 }
 0x6a4   :  { %v718_v3 = vmul.f32 0.7978846, %v716_v63 }
 0x6a5   :  { %1102 = vtanh.f32 %v719_v2 }
 0x6a6   :  { %1104 = vtanh.f32 %v718_v3 }
 0x6af   :  { %v1103_v4 = vpop.eup %1102 }
 0x6b0   :  { %v1105_v7 = vpop.eup %1104  ;;  %v723_v8 = vadd.f32 1.0, %v1103_v4 }
 0x6b1   :  { %v722_v44 = vadd.f32 1.0, %v1105_v7 }
 0x6b2   :  { %v725_v11 = vmul.f32 %v723_v8, %v709_v45 }
 0x6b3   :  { %v724_v10 = vmul.f32 %v722_v44, %v708_v9 }
 0x6b5   :  { %1004 = vmatprep.mubr.msk.f32.mxu1 %vm319_vm2, %v724_v10 }
 0x6b6   :  { %1005 = vmatmul.mubr.msk.f32.vlgmr.msra.gmra.mrb[4].mxu1 %vm319_vm2, %v725_v11 }
 0x789   :  { %v1006_v12 = vpop.f32.mrb[4].mxu1 }
 0x78a   :  { %v819_v13 = vadd.f32 %v1006_v12, %v896_v1  ;;  %v813_v0 = vpop.f32.mrb[5].mxu1 }
 0x78b   :  { %v814_v15 = vadd.f32 %v896_v1, %v813_v0 }
 0x78c   :  { %v823_v14 = vadd.f32 %v819_v13, %v1363_v5 }
 0x78d   :  { %v822_v16 = vadd.f32 %v814_v15, %v1366_v6 }
 0x78e   :  { %834 = vrot.lane.b32.xlu0 %v823_v14, %s1131_s14  ;;  %828 = vrot.lane.b32.xlu1 %v823_v14, %s1132_s15 }
 0x792   :  { %832 = vrot.lane.b32.xlu1 %v822_v16, %s1131_s14  ;;  %826 = vrot.lane.b32.xlu0 %v822_v16, %s1132_s15 }
 0x796   :  { %838 = vrot.lane.b32.xlu1 %v822_v16, %s1133_s0  ;;  %840 = vrot.lane.b32.xlu0 %v823_v14, %s1133_s0 }
 0x800   :  { %v835_v19 = vpop.permute.xlu0 %834  ;;  %v829_v20 = vpop.permute.xlu1 %828 }
 0x801   :  { %v845_v24 = vsel %vm49_vm0, %v823_v14, %v829_v20 }
 0x802   :  { %v847_v6 = vsel %vm319_vm2, %v845_v24, %v835_v19 }
 0x804   :  { %v833_v22 = vpop.permute.xlu1 %832  ;;  %v827_v23 = vpop.permute.xlu0 %826 }
 0x805   :  { %v844_v5 = vsel %vm49_vm0, %v822_v16, %v827_v23 }
 0x806   :  { %v846_v26 = vsel %vm319_vm2, %v844_v5, %v833_v22 }
 0x808   :  { %v839_v25 = vpop.permute.xlu1 %838  ;;  %v841_v27 = vpop.permute.xlu0 %840 }
 0x809   :  { %v849_v28 = vsel %vm848_vm5, %v846_v26, %v839_v25  ;;  %v850_v29 = vsel %vm848_vm5, %v847_v6, %v841_v27 }
 0x80a   :  { %851 = vst [vmem:[#allocation2] sm:$0xff] %v849_v28  ;;  %852 = vst [vmem:[#allocation2 + $0x8] sm:$0xff] %v850_v29 }
 0x80b   :  { %1117 = shalt.err (!%p1114_p4)
}
 0x80c   :  { %s1118_s9 = scalar_lea.hbm %s1459_s13, 256 }
 0x80d   :  { %p1119_p5 = scmp.ne.s32.totalorder %s1459_s13, %s1118_s9  ;;  %p1122_p6 = scmp.lt.u32.totalorder %s1118_s9, %s1459_s13 }
 0x80f   :  { %p1124_p7 = pnand %p1122_p6, %p1119_p5 }
 0x811   :  { %1127 = shalt.err (!%p1124_p7)
}
 0x812   :  { %s1135_s23 = smov 128   ;;  %s1136_s24 = smov 8  }
 0x813   :  { %864 = dma.vmem_to_hbm [thread:$0]  %s859_s16, 256, %s1459_s13, [#allocation3], %s1135_s23, %s1135_s23, %s1136_s24  }
 0x814   :  { %1128 = dma.done.wait [#allocation3], 256  }
 0x815   :  { %1129 = vsyncadd [#allocation3], 4294967040 }
 0x816   :  { %868 = vsyncpa [#allocation3], 1 }

</bundles_post_ra>
